<compile_context>
chip_gen: v5e
topology: v5e:2x2
jax: 0.10.0
libtpu: 0.0.40
codegen_flags: <defaults>
</compile_context>

<pallas_src>
import functools
import math

import jax
import jax.numpy as jnp
from jax.experimental import pallas as pl
from jax.experimental.pallas import tpu as pltpu

LN_EPS = 1e-5                      # torch.nn.LayerNorm default
_LANE = 128
_INV_SQRT2 = 1.0 / math.sqrt(2.0)


def _round_up(x, m):
    return ((x + m - 1) // m) * m


def _vmem_budget():
    """~80% of per-core VMEM (v7x 64 MiB -> ~51 MiB, v5e/v6e 128 MiB -> ~102 MiB)."""
    try:
        cap = int(pltpu.get_tpu_info().vmem_capacity_bytes)
    except Exception:              # conservative fallback
        cap = 64 * 1024 * 1024
    return int(cap * 0.8)


def _vmem_estimate(c, ts, to, x_item, w_item, o_item):
    """Bytes for one grid step, incl. double buffers, LN cache and f32 temps."""
    x_bytes = 2 * c * ts * x_item            # double-buffered x slab
    w_bytes = 2 * 2 * c * to * w_item        # W_h + W_gate tiles (2 bufs each)
    b_bytes = 2 * 2 * to * 4                 # biases
    o_bytes = 2 * to * ts * o_item           # double-buffered output tile
    xn_scr = c * ts * w_item                 # LayerNorm cache scratch
    f32_tmp = (2 * c + 3 * to) * ts * 4      # x upcast, xn f32, h, g, gelu temps
    return x_bytes + w_bytes + b_bytes + o_bytes + xn_scr + f32_tmp


def _geglu_kernel(x_ref, gamma_ref, beta_ref, wh_ref, wg_ref, bh_ref, bg_ref,
                  o_ref, xn_ref, *, approx_gelu):
    # x_ref:      (C, TS)  channels-first token slab
    # gamma/beta: (C, 1)
    # wh/wg_ref:  (C, TO)  column tiles of the split projection
    # bh/bg_ref:  (TO, 1)
    # o_ref:      (TO, TS) channels-first output tile
    # xn_ref:     (C, TS)  VMEM scratch holding the normalized tokens
    j = pl.program_id(2)

    # LayerNorm is per-token (per-column); it only depends on the token tile,
    # so compute it once (j == 0) and reuse the cached result for other OUT tiles.
    @pl.when(j == 0)
    def _():
        x = x_ref[...].astype(jnp.float32)                         # (C, TS)
        mean = jnp.mean(x, axis=0, keepdims=True)                  # (1, TS)
        var = jnp.mean(jnp.square(x - mean), axis=0, keepdims=True)
        xn = (x - mean) * jax.lax.rsqrt(var + LN_EPS)
        xn = xn * gamma_ref[...].astype(jnp.float32) + beta_ref[...].astype(jnp.float32)
        xn_ref[...] = xn.astype(xn_ref.dtype)                      # MXU dtype (e.g. bf16)

    xn = xn_ref[...]
    # (C, TO)^T @ (C, TS) -> (TO, TS): MXU consumes the transposed LHS and the
    # result is already channels-first, so no transposes anywhere.
    dn = (((0,), (0,)), ((), ()))
    h = jax.lax.dot_general(wh_ref[...], xn, dn, preferred_element_type=jnp.float32)
    g = jax.lax.dot_general(wg_ref[...], xn, dn, preferred_element_type=jnp.float32)
    h = h + bh_ref[...].astype(jnp.float32)
    g = g + bg_ref[...].astype(jnp.float32)

    if approx_gelu:
        # tanh-approx GELU: transcendental goes to the EUP slot, frees VALU.
        gelu_g = 0.5 * g * (1.0 + jnp.tanh(0.7978845608028654 * (g + 0.044715 * g * g * g)))
    else:
        # Exact (erf) GELU: matches torch.nn.functional.gelu default.
        gelu_g = 0.5 * g * (1.0 + jax.lax.erf(g * _INV_SQRT2))

    o_ref[...] = (h * gelu_g).astype(o_ref.dtype)


def prepare_geglu_params(w, b, out_channels, out_pad, param_dtype=None):
    """Split fused Linear(in, 2*out) params into the kernel's layout.

    w: (C, 2*OUT) (nn.Linear weight transposed to in x out), b: (2*OUT,)-like.
    Returns (w_h, w_gate, b_h, b_gate); the OUT axis is zero-padded to out_pad
    and biases are (out_pad, 1) for lane-broadcast in the channels-first kernel.
    """
    c, two_out = w.shape
    assert two_out == 2 * out_channels
    b = jnp.reshape(b, (two_out,))
    w_h, w_gate = w[:, :out_channels], w[:, out_channels:]
    b_h, b_gate = b[:out_channels], b[out_channels:]
    pad = out_pad - out_channels
    if pad:
        w_h = jnp.pad(w_h, ((0, 0), (0, pad)))
        w_gate = jnp.pad(w_gate, ((0, 0), (0, pad)))
        b_h = jnp.pad(b_h, (0, pad))
        b_gate = jnp.pad(b_gate, (0, pad))
    if param_dtype is not None:
        w_h = w_h.astype(param_dtype)
        w_gate = w_gate.astype(param_dtype)
    return w_h, w_gate, b_h.reshape(out_pad, 1), b_gate.reshape(out_pad, 1)


def geglu_forward(x, gamma, beta, w, b, *, out_channels,
                  param_dtype=jnp.bfloat16, approx_gelu=False,
                  token_tile=512, out_tile=None, out_dtype=None):
    """GEGLU forward on NCHW input: x (B, C, *spatial) -> (B, OUT, *spatial)."""
    bsz, c, *spatial = x.shape
    s = 1
    for d in spatial:
        s *= d
    x3 = x.reshape(bsz, c, s)
    out_dtype = x.dtype if out_dtype is None else out_dtype

    # gamma/beta as (C, 1) for lane-broadcast in the channels-first layout.
    gamma = jnp.reshape(gamma, (c, 1)).astype(jnp.float32)
    beta = jnp.reshape(beta, (c, 1)).astype(jnp.float32)

    x_item = x.dtype.itemsize
    w_item = (jnp.dtype(param_dtype).itemsize if param_dtype is not None
              else w.dtype.itemsize)
    o_item = jnp.dtype(out_dtype).itemsize
    budget = _vmem_budget()

    # --- spatial (token) tile: multiple of 128 or the full extent ------------
    ts = s if s <= token_tile else token_tile
    gi = pl.cdiv(s, ts)
    # v7x has 2 TensorCores: make sure the parallel axes expose >= 2 blocks.
    if bsz == 1 and gi == 1 and s > _LANE:
        ts = _round_up(pl.cdiv(s, 2), _LANE)
        gi = pl.cdiv(s, ts)

    # --- OUT tile: prefer fully weight-resident (single j tile) --------------
    if (out_tile is None and
            1.3 * _vmem_estimate(c, ts, out_channels, x_item, w_item, o_item) <= budget):
        out_pad, to = out_channels, out_channels          # W DMA'd exactly once
    else:
        out_pad = _round_up(out_channels, _LANE)
        if out_tile is not None:
            assert out_tile % _LANE == 0
            to = out_tile
        else:
            to = _LANE
            for cand in range(out_pad, 0, -_LANE):
                if (out_pad % cand == 0 and
                        1.3 * _vmem_estimate(c, ts, cand, x_item, w_item, o_item) <= budget):
                    to = cand
                    break
    gj = pl.cdiv(out_pad, to)

    est = _vmem_estimate(c, ts, to, x_item, w_item, o_item)
    vmem_limit = int(min(budget, max(32 * 1024 * 1024, 2 * est)))

    w_h, w_gate, b_h, b_gate = prepare_geglu_params(w, b, out_channels, out_pad, param_dtype)
    kernel = functools.partial(_geglu_kernel, approx_gelu=approx_gelu)

    out = pl.pallas_call(
        kernel,
        out_shape=jax.ShapeDtypeStruct((bsz, out_channels, s), out_dtype),
        grid_spec=pltpu.PrefetchScalarGridSpec(
            num_scalar_prefetch=0,
            grid=(bsz, gi, gj),
            in_specs=[
                pl.BlockSpec((pl.Squeezed(), c, ts), lambda bi, i, j: (bi, 0, i)),  # x slab
                pl.BlockSpec((c, 1), lambda bi, i, j: (0, 0)),                      # gamma
                pl.BlockSpec((c, 1), lambda bi, i, j: (0, 0)),                      # beta
                pl.BlockSpec((c, to), lambda bi, i, j: (0, j)),                     # W_h
                pl.BlockSpec((c, to), lambda bi, i, j: (0, j)),                     # W_gate
                pl.BlockSpec((to, 1), lambda bi, i, j: (j, 0)),                     # b_h
                pl.BlockSpec((to, 1), lambda bi, i, j: (j, 0)),                     # b_gate
            ],
            out_specs=pl.BlockSpec((pl.Squeezed(), to, ts), lambda bi, i, j: (bi, j, i)),
            scratch_shapes=[pltpu.VMEM((c, ts), w_h.dtype)],                        # LN cache
        ),
        compiler_params=pltpu.CompilerParams(
            dimension_semantics=("parallel", "parallel", "arbitrary"),
            vmem_limit_bytes=vmem_limit),
    )(x3, gamma, beta, w_h, w_gate, b_h, b_gate)

    return out.reshape(bsz, out_channels, *spatial)


def geglu_reference(x, gamma, beta, w, b, *, out_channels):
    bsz, c, *spatial = x.shape
    s = 1
    for d in spatial:
        s *= d
    xt = jnp.transpose(x.reshape(bsz, c, s), (0, 2, 1))            # (B, S, C)
    mean = jnp.mean(xt, axis=-1, keepdims=True)
    var = jnp.mean(jnp.square(xt - mean), axis=-1, keepdims=True)
    xn = (xt - mean) / jnp.sqrt(var + LN_EPS) * jnp.reshape(gamma, (c,)) + jnp.reshape(beta, (c,))
    y = jnp.matmul(xn, w, precision=jax.lax.Precision.HIGHEST) + jnp.reshape(b, (-1,))
    h, gate = y[..., :out_channels], y[..., out_channels:]
    out = h * (0.5 * gate * (1.0 + jax.lax.erf(gate * _INV_SQRT2)))
    return jnp.transpose(out, (0, 2, 1)).reshape(bsz, out_channels, *spatial)


if __name__ == "__main__":
    key = jax.random.PRNGKey(0)

    # --- Test 1: exact-parity path (f32 params, exact erf GELU, resident W) ---
    in_channels, out_channels = 4, 8
    B, H, W = 2, 16, 16
    kx, kg, kb, kw, kbi, k2 = jax.random.split(key, 6)
    x = jax.random.normal(kx, (B, in_channels, H, W), dtype=jnp.float32)
    gamma = (1.0 + 0.1 * jax.random.normal(kg, (in_channels,))).astype(jnp.float32)
    beta = (0.1 * jax.random.normal(kb, (in_channels,))).astype(jnp.float32)
    # nn.Linear(in, 2*out): weight (2*out, in); stored transposed (in, 2*out).
    w = (jax.random.normal(kw, (in_channels, 2 * out_channels)) /
         math.sqrt(in_channels)).astype(jnp.float32)
    b = (0.05 * jax.random.normal(kbi, (2 * out_channels,))).astype(jnp.float32)

    out = geglu_forward(x, gamma, beta, w, b, out_channels=out_channels,
                        param_dtype=jnp.float32)
    out = jax.block_until_ready(out)
    ref = geglu_reference(x, gamma, beta, w, b, out_channels=out_channels)
    assert out.shape == (B, out_channels, H, W)
    assert jnp.allclose(out, ref, atol=1e-4, rtol=1e-4)

    # --- Test 2: bf16 weights, ragged token block, tiled OUT (not 128-mult),
    #             LayerNorm cache across OUT tiles ----------------------------
    in2, out2 = 32, 160          # OUT not a multiple of 128 -> masked last tile
    B2, H2, W2 = 1, 10, 13       # S = 130 -> ragged last token block at ts=128
    k2x, k2g, k2b, k2w, k2bi = jax.random.split(k2, 5)
    x2 = jax.random.normal(k2x, (B2, in2, H2, W2), dtype=jnp.float32)
    gamma2 = (1.0 + 0.1 * jax.random.normal(k2g, (in2,))).astype(jnp.float32)
    beta2 = (0.1 * jax.random.normal(k2b, (in2,))).astype(jnp.float32)
    w2 = (jax.random.normal(k2w, (in2, 2 * out2)) / math.sqrt(in2)).astype(jnp.float32)
    b2 = (0.05 * jax.random.normal(k2bi, (2 * out2,))).astype(jnp.float32)

    out_b = geglu_forward(x2, gamma2, beta2, w2, b2, out_channels=out2,
                          param_dtype=jnp.bfloat16, token_tile=128, out_tile=128)
    out_b = jax.block_until_ready(out_b)
    ref2 = geglu_reference(x2, gamma2, beta2, w2, b2, out_channels=out2)
    assert out_b.shape == (B2, out2, H2, W2)
    assert jnp.allclose(out_b, ref2, atol=1e-1, rtol=1e-1)

    print("KERNEL_OK")
</pallas_src>

<mosaic_0001>
module attributes {stable_mosaic.version = 11 : i64} {
  func.func @_geglu_kernel(%arg0: i32, %arg1: i32, %arg2: i32, %arg3: memref<1x4x256xf32, #tpu.memory_space<vmem>>, %arg4: memref<4x1xf32, #tpu.memory_space<vmem>>, %arg5: memref<4x1xf32, #tpu.memory_space<vmem>>, %arg6: memref<4x8xf32, #tpu.memory_space<vmem>>, %arg7: memref<4x8xf32, #tpu.memory_space<vmem>>, %arg8: memref<8x1xf32, #tpu.memory_space<vmem>>, %arg9: memref<8x1xf32, #tpu.memory_space<vmem>>, %arg10: memref<1x8x256xf32, #tpu.memory_space<vmem>>, %arg11: memref<4x256xf32, #tpu.memory_space<vmem>>) attributes {dimension_semantics = [#tpu.dimension_semantics<parallel>, #tpu.dimension_semantics<parallel>, #tpu.dimension_semantics<arbitrary>], iteration_bounds = array<i64: 2, 1, 1>, scalar_prefetch = 0 : i64, scratch_operands = 1 : i64, tpu.core_type = #tpu.core_type<tc>, window_params = [{transform_indices = @transform_0, window_bounds = array<i64: 1, 4, 256>}, {pipeline_mode = #tpu.pipeline_mode<synchronous>, transform_indices = @transform_1, window_bounds = array<i64: 4, 1>}, {pipeline_mode = #tpu.pipeline_mode<synchronous>, transform_indices = @transform_2, window_bounds = array<i64: 4, 1>}, {transform_indices = @transform_3, window_bounds = array<i64: 4, 8>}, {transform_indices = @transform_4, window_bounds = array<i64: 4, 8>}, {transform_indices = @transform_5, window_bounds = array<i64: 8, 1>}, {transform_indices = @transform_6, window_bounds = array<i64: 8, 1>}, {transform_indices = @transform_7, window_bounds = array<i64: 1, 8, 256>}]} {
    %c0_i32 = arith.constant 0 : i32
    %0 = arith.cmpi eq, %arg2, %c0_i32 : i32
    %1 = arith.extui %0 : i1 to i32
    %c0_i32_0 = arith.constant 0 : i32
    %2 = arith.cmpi ne, %1, %c0_i32_0 : i32
    scf.if %2 {
      %c0_17 = arith.constant 0 : index
      %c0_18 = arith.constant 0 : index
      %c0_19 = arith.constant 0 : index
      %26 = vector.load %arg3[%c0_17, %c0_18, %c0_19] : memref<1x4x256xf32, #tpu.memory_space<vmem>>, vector<1x4x256xf32>
      %27 = vector.shape_cast %26 : vector<1x4x256xf32> to vector<4x256xf32>
      %cst_20 = arith.constant dense<0.000000e+00> : vector<256xf32>
      %28 = vector.multi_reduction <add>, %27, %cst_20 [0] : vector<4x256xf32> to vector<256xf32>
      %29 = vector.shape_cast %28 : vector<256xf32> to vector<1x256xf32>
      %cst_21 = arith.constant 4.000000e+00 : f32
      %30 = vector.broadcast %cst_21 : f32 to vector<1x256xf32>
      %31 = arith.divf %29, %30 : vector<1x256xf32>
      %32 = vector.broadcast %31 : vector<1x256xf32> to vector<4x256xf32>
      %33 = arith.subf %27, %32 : vector<4x256xf32>
      %34 = arith.mulf %33, %33 : vector<4x256xf32>
      %cst_22 = arith.constant dense<0.000000e+00> : vector<256xf32>
      %35 = vector.multi_reduction <add>, %34, %cst_22 [0] : vector<4x256xf32> to vector<256xf32>
      %36 = vector.shape_cast %35 : vector<256xf32> to vector<1x256xf32>
      %cst_23 = arith.constant 4.000000e+00 : f32
      %37 = vector.broadcast %cst_23 : f32 to vector<1x256xf32>
      %38 = arith.divf %36, %37 : vector<1x256xf32>
      %39 = vector.broadcast %31 : vector<1x256xf32> to vector<4x256xf32>
      %40 = arith.subf %27, %39 : vector<4x256xf32>
      %cst_24 = arith.constant 9.99999974E-6 : f32
      %41 = vector.broadcast %cst_24 : f32 to vector<1x256xf32>
      %42 = arith.addf %38, %41 : vector<1x256xf32>
      %43 = math.rsqrt %42 : vector<1x256xf32>
      %44 = vector.broadcast %43 : vector<1x256xf32> to vector<4x256xf32>
      %45 = arith.mulf %40, %44 : vector<4x256xf32>
      %c0_25 = arith.constant 0 : index
      %c0_26 = arith.constant 0 : index
      %46 = vector.load %arg4[%c0_25, %c0_26] : memref<4x1xf32, #tpu.memory_space<vmem>>, vector<4x1xf32>
      %47 = vector.broadcast %46 : vector<4x1xf32> to vector<4x256xf32>
      %48 = arith.mulf %45, %47 : vector<4x256xf32>
      %c0_27 = arith.constant 0 : index
      %c0_28 = arith.constant 0 : index
      %49 = vector.load %arg5[%c0_27, %c0_28] : memref<4x1xf32, #tpu.memory_space<vmem>>, vector<4x1xf32>
      %50 = vector.broadcast %49 : vector<4x1xf32> to vector<4x256xf32>
      %51 = arith.addf %48, %50 : vector<4x256xf32>
      %c0_29 = arith.constant 0 : index
      %c0_30 = arith.constant 0 : index
      %52 = vector.load %arg11[%c0_29, %c0_30] : memref<4x256xf32, #tpu.memory_space<vmem>>, vector<4x256xf32>
      tpu.vector_store %arg11[%c0_29, %c0_30], %51 {strides = array<i32>} : memref<4x256xf32, #tpu.memory_space<vmem>>, vector<4x256xf32>,
    } else {
    }
    %c0 = arith.constant 0 : index
    %c0_1 = arith.constant 0 : index
    %3 = vector.load %arg11[%c0, %c0_1] : memref<4x256xf32, #tpu.memory_space<vmem>>, vector<4x256xf32>
    %c0_2 = arith.constant 0 : index
    %c0_3 = arith.constant 0 : index
    %4 = vector.load %arg6[%c0_2, %c0_3] : memref<4x8xf32, #tpu.memory_space<vmem>>, vector<4x8xf32>
    %cst = arith.constant dense<0.000000e+00> : vector<8x256xf32>
    %5 = tpu.matmul %4, %3, %cst {dimension_numbers = #tpu.dot_dimension_numbers<[0], [0], [1], [1], [0, 1, 1, 1], [], []>} : vector<4x8xf32>, vector<4x256xf32>, vector<8x256xf32> -> vector<8x256xf32>
    %c0_4 = arith.constant 0 : index
    %c0_5 = arith.constant 0 : index
    %6 = vector.load %arg7[%c0_4, %c0_5] : memref<4x8xf32, #tpu.memory_space<vmem>>, vector<4x8xf32>
    %cst_6 = arith.constant dense<0.000000e+00> : vector<8x256xf32>
    %7 = tpu.matmul %6, %3, %cst_6 {dimension_numbers = #tpu.dot_dimension_numbers<[0], [0], [1], [1], [0, 1, 1, 1], [], []>} : vector<4x8xf32>, vector<4x256xf32>, vector<8x256xf32> -> vector<8x256xf32>
    %c0_7 = arith.constant 0 : index
    %c0_8 = arith.constant 0 : index
    %8 = vector.load %arg8[%c0_7, %c0_8] : memref<8x1xf32, #tpu.memory_space<vmem>>, vector<8x1xf32>
    %9 = vector.broadcast %8 : vector<8x1xf32> to vector<8x256xf32>
    %10 = arith.addf %5, %9 : vector<8x256xf32>
    %c0_9 = arith.constant 0 : index
    %c0_10 = arith.constant 0 : index
    %11 = vector.load %arg9[%c0_9, %c0_10] : memref<8x1xf32, #tpu.memory_space<vmem>>, vector<8x1xf32>
    %12 = vector.broadcast %11 : vector<8x1xf32> to vector<8x256xf32>
    %13 = arith.addf %7, %12 : vector<8x256xf32>
    %cst_11 = arith.constant 5.000000e-01 : f32
    %14 = vector.broadcast %cst_11 : f32 to vector<8x256xf32>
    %15 = arith.mulf %14, %13 : vector<8x256xf32>
    %cst_12 = arith.constant 0.707106769 : f32
    %16 = vector.broadcast %cst_12 : f32 to vector<8x256xf32>
    %17 = arith.mulf %13, %16 : vector<8x256xf32>
    %18 = math.erf %17 : vector<8x256xf32>
    %cst_13 = arith.constant 1.000000e+00 : f32
    %19 = vector.broadcast %cst_13 : f32 to vector<8x256xf32>
    %20 = arith.addf %19, %18 : vector<8x256xf32>
    %21 = arith.mulf %15, %20 : vector<8x256xf32>
    %22 = arith.mulf %10, %21 : vector<8x256xf32>
    %c0_14 = arith.constant 0 : index
    %c0_15 = arith.constant 0 : index
    %c0_16 = arith.constant 0 : index
    %23 = vector.load %arg10[%c0_14, %c0_15, %c0_16] : memref<1x8x256xf32, #tpu.memory_space<vmem>>, vector<1x8x256xf32>
    %24 = vector.shape_cast %23 : vector<1x8x256xf32> to vector<8x256xf32>
    %25 = vector.shape_cast %22 : vector<8x256xf32> to vector<1x8x256xf32>
    tpu.vector_store %arg10[%c0_14, %c0_15, %c0_16], %25 {strides = array<i32>} : memref<1x8x256xf32, #tpu.memory_space<vmem>>, vector<1x8x256xf32>,
    return
  }
  func.func @transform_0(%arg0: i32, %arg1: i32, %arg2: i32) -> (i32, i32, i32) {
    %c0_i32 = arith.constant 0 : i32
    %c0_i32_0 = arith.constant 0 : i32
    return %arg0, %c0_i32, %arg1 : i32, i32, i32
  }
  func.func @transform_1(%arg0: i32, %arg1: i32, %arg2: i32) -> (i32, i32) {
    %c0_i32 = arith.constant 0 : i32
    %c0_i32_0 = arith.constant 0 : i32
    %c0_i32_1 = arith.constant 0 : i32
    return %c0_i32, %c0_i32_0 : i32, i32
  }
  func.func @transform_2(%arg0: i32, %arg1: i32, %arg2: i32) -> (i32, i32) {
    %c0_i32 = arith.constant 0 : i32
    %c0_i32_0 = arith.constant 0 : i32
    %c0_i32_1 = arith.constant 0 : i32
    return %c0_i32, %c0_i32_0 : i32, i32
  }
  func.func @transform_3(%arg0: i32, %arg1: i32, %arg2: i32) -> (i32, i32) {
    %c0_i32 = arith.constant 0 : i32
    %c0_i32_0 = arith.constant 0 : i32
    return %c0_i32, %arg2 : i32, i32
  }
  func.func @transform_4(%arg0: i32, %arg1: i32, %arg2: i32) -> (i32, i32) {
    %c0_i32 = arith.constant 0 : i32
    %c0_i32_0 = arith.constant 0 : i32
    return %c0_i32, %arg2 : i32, i32
  }
  func.func @transform_5(%arg0: i32, %arg1: i32, %arg2: i32) -> (i32, i32) {
    %c0_i32 = arith.constant 0 : i32
    %c0_i32_0 = arith.constant 0 : i32
    return %arg2, %c0_i32 : i32, i32
  }
  func.func @transform_6(%arg0: i32, %arg1: i32, %arg2: i32) -> (i32, i32) {
    %c0_i32 = arith.constant 0 : i32
    %c0_i32_0 = arith.constant 0 : i32
    return %arg2, %c0_i32 : i32, i32
  }
  func.func @transform_7(%arg0: i32, %arg1: i32, %arg2: i32) -> (i32, i32, i32) {
    %c0_i32 = arith.constant 0 : i32
    return %arg0, %arg2, %arg1 : i32, i32, i32
  }
}

</mosaic_0001>

<bundles_post_ra>
// kernel: tpu_custom_call.1
= control target key start
LH: loop header
LB: loop body
LE: loop exit
PB: predicated region body
PF: predicated region fallthrough
CT: control target
= control target key end

     0   :  { %12 = vsyncpa [#allocation4], 0  ;;  %s1306_s0 = inlined_call_operand.vmem [shape: f32[2,4,256], index: 0, kind: input, shape index: {}]   ;;  %s1307_s1 = inlined_call_operand.vmem [shape: f32[4,1], index: 1, kind: input, shape index: {}]   ;;  %s1308_s2 = inlined_call_operand.vmem [shape: f32[4,1], index: 2, kind: input, shape index: {}]   ;;  %s1309_s3 = inlined_call_operand.vmem [shape: f32[4,8], index: 3, kind: input, shape index: {}]   ;;  %s1310_s4 = inlined_call_operand.vmem [shape: f32[4,8], index: 4, kind: input, shape index: {}]   ;;  %s1311_s5 = inlined_call_operand.vmem [shape: f32[8,1], index: 5, kind: input, shape index: {}]   ;;  %s1312_s6 = inlined_call_operand.vmem [shape: f32[8,1], index: 6, kind: input, shape index: {}]   ;;  %s1313_s7 = inlined_call_operand.hbm [shape: f32[2,8,256], index: 7, kind: output, shape index: {}]  }
   0x1   :  { %14 = vsyncpa [#allocation4 + $0x1], 0  ;;  %s1159_s24 = smov 0   ;;  %s1161_s25 = smov 0  }
   0x2   :  { %s1163_s26 = smov 0   ;;  %s1165_s27 = smov 0  }
   0x3   :  { %s1167_s28 = smov 0   ;;  %s1169_s29 = smov 0  }
   0x4 LB: > { %s936_s30 = sadd.s32 4294967295, %s1114_s29   ;;  %s937_s8 = sadd.s32 4294967294, %s1114_s29   ;;  %s1114_s29 = sphi %s1169_s29, %s20_s29   ;;  %s1110_s28 = sphi %s1167_s28, %s1320_s28   ;;  %s1106_s27 = sphi %s1165_s27, %s1319_s27   ;;  %s1102_s26 = sphi %s1163_s26, %s1318_s26   ;;  %s1098_s25 = sphi %s1161_s25, %s1317_s25   ;;  %s1094_s24 = sphi %s1159_s24, %s1316_s24  }
   0x5   : > { %s39_s9 = sadd.s32 1, %s1110_s28  ;;  %s224_s10 = sadd.s32 1, %s1102_s26 }
   0x6   : > { %p41_p0 = scmp.ge.s32.totalorder %s39_s9, 2  ;;  %p234_p1 = scmp.ne.s32.totalorder %s1102_s26, %s1098_s25 }
   0x7   : > { %p235_p2 = scmp.eq.s32.totalorder %s936_s30, 1  ;;  %p240_p3 = scmp.ne.s32.totalorder %s1098_s25, %s1094_s24 }
   0x8   : > { %s1322_s9 = smov (%p41_p0, %s39_s9), 0  ;;  %p241_p5 = scmp.eq.s32.totalorder %s937_s8, 1 }
   0x9   : > { %p1199_p4 = por %p235_p2, %p234_p1  ;;  %s217_s12 = ssub.s32 %s1110_s28, %s1322_s9 }
   0xa   : > { %p944_p6 = scmp.ge.s32.totalorder %s1114_s29, 1  ;;  %p222_p7 = scmp.eq.s32.totalorder %s217_s12, 0 }
   0xb   : > { %p1206_p8 = por %p241_p5, %p240_p3  ;;  %p306_p9 = scmp.lt.s32.totalorder %s1114_s29, 3 }
   0xc   : > { %s1212_s14 = scalar_select %p222_p7, %s1102_s26, %s224_s10  }
   0xd   : > { %p307_p10 = pnand %p944_p6, %p306_p9 }
   0xe   : > { %p359_p11 = scmp.lt.s32.totalorder (!%p307_p10), %s1106_s27, 1  ;;  %s355_s19 = sand.u32 (!%p307_p10), 1, %s1098_s25  }
   0xf   : > { %310 = sbr.rel (%p307_p10) target bundleno = 377 (0x179), region = 48  ;;  %s945_s20 = sshll.u32 (!%p307_p10), %s355_s19, 4 }
  0x10   : > { %s964_s21 = sshll.u32 (!%p307_p10), %s1106_s27, 4 }
  0x14   : > { %v502_v0 = vld [vmem:[%s1310_s4] sm:$0xf]  ;;  %v1116_v2 = vmov 0   ;;  %s360_s23 = scalar_select %p359_p11, %s1106_s27, 1  ;;  %v1117_v6 = vmov 4.0   ;;  %vm396_vm0 = vcmask 1043456  }
  0x15   : > { %v477_v1 = vld [vmem:[%s1307_s1] sm:$0xf]  ;;  %600 = vxpose.xlu1.b32.start.end [1/1] (short) (narrow) %v502_v0, 8  ;;  %1024 = vset.pattern.permute.xlu0 %v1116_v2  ;;  %1026 = vrcp.f32 %v1117_v6  ;;  %vm545_vm8 = vcmask 31744   ;;  %s357_s27 = scalar_lea.vmem [#allocation3], %s945_s20  ;;  %s1056_s20 = scalar_lea.hbm %s1313_s7, 32 }
  0x16   : > { %480 = vperm.xlu0 %1024, %v477_v1   ;;  %1025 = vset.pattern.permute.xlu2 %v1116_v2  ;;  %v501_v3 = vld [vmem:[%s1309_s3] sm:$0xf]  ;;  %s963_s30 = sshll.u32 %s360_s23, 3  ;;  %s792_s8 = sshll.u32 %s357_s27, 4  ;;  %s793_s8 = int_to_ptr.vmem [resolvable:$true] %s792_s8 }
  0x17   : > { %v488_v4 = vld [vmem:[%s1308_s2] sm:$0xf]  ;;  %s366_s12 = scalar_lea.vmem %s1306_s0, %s963_s30  ;;  %s790_s30 = scalar_lea.hbm %s1313_s7, %s964_s21 }
  0x18   : > { %v389_v5 = vld [vmem:[%s366_s12] sm:$0xff]  ;;  %s794_s10 = sshll.u32 %s790_s30, 4  ;;  %s775_s12 = scalar_lea.sflag [#allocation4], %s355_s19  ;;  %s795_s10 = int_to_ptr.hbm [resolvable:$true] %s794_s10 }
  0x19   : > { %391 = vst [vmem:[#allocation1] ss:$2 sm:$0xff] %v389_v5  ;;  %s1050_s15 = sshra.s32 %s795_s10, 4  ;;  %s1051_s15 = int_to_ptr.hbm [resolvable:$true] %s1050_s15 }
  0x1a   : > { %s1052_s16 = scalar_lea.hbm %s1051_s15, 16  ;;  %p1057_p1 = scmp.lt.s32.totalorder %s1051_s15, %s1313_s7 }
  0x1b   : > { %v1027_v12 = vpop.eup %1026  ;;  %p1053_p12 = scmp.ne.s32.totalorder %s1051_s15, %s1052_s16  ;;  %p1058_p2 = scmp.lt.s32.totalorder %s1056_s20, %s1052_s16 }
  0x1c   : > { %v412_v15 = vmul.f32 4.0, %v1027_v12  ;;  %vm416_vm1 = vweird.f32 %v1027_v12 }
  0x1d   : > { %509 = vxpose.xlu1.b32.start.end [1/1] (short) (narrow) %v501_v3, 8  ;;  %p1054_p13 = pnand %p1053_p12, %p1199_p4  ;;  %p1059_p3 = por %p1058_p2, %p1057_p1 }
  0x1e   : > { %491 = vperm.xlu0 %1024, %v488_v4   ;;  %v413_v18 = vsub.f32 1.0, %v412_v15  ;;  %v1118_v4 = vmov 839922192  }
  0x1f   : > { %p1055_p0 = pneg %p1054_p13 }
  0x20   : > { %v393_v7 = vld.sshfl [vmem:[#allocation1 + $0x8] sm:$0xff pattern:$0x75316420]  ;;  %v392_v9 = vld.sshfl [vmem:[#allocation1] sm:$0xff pattern:$0x75316420]  ;;  %v414_v21 = vmul.f32 %v1027_v12, %v413_v18 }
  0x21   : > { %v404_v8 = vsel %vm396_vm0, %v393_v7, 0.0  ;;  %v397_v11 = vsel %vm396_vm0, %v392_v9, 0.0  ;;  %p1060_p5 = pnand %p1059_p3, %p1055_p0 }
  0x22   : > { %v405_v10 = vrot.slane %v404_v8, 4  ;;  %v398_v13 = vrot.slane %v397_v11, 4  ;;  %v415_v24 = vadd.f32 %v1027_v12, %v414_v21 }
  0x24   : > { %v406_v14 = vadd.f32 %v405_v10, %v404_v8  ;;  %v399_v16 = vadd.f32 %v398_v13, %v397_v11  ;;  %v417_v27 = vsel %vm416_vm1, %v1027_v12, %v415_v24 }
  0x26   : > { %v407_v17 = vrot.slane %v406_v14, 2  ;;  %v400_v19 = vrot.slane %v399_v16, 2 }
  0x28   : > { %v408_v20 = vadd.f32 %v407_v17, %v406_v14  ;;  %v401_v22 = vadd.f32 %v400_v19, %v399_v16  ;;  %v594_v19 = vld [vmem:[%s1312_s6] sm:$0xff] }
  0x29   : > { %597 = vperm.xlu2 %1025, %v594_v19  }
  0x2a   : > { %v409_v23 = vrot.slane %v408_v20, 1  ;;  %v402_v25 = vrot.slane %v401_v22, 1 }
  0x2c   : > { %v410_v26 = vadd.f32 %v409_v23, %v408_v20  ;;  %v403_v28 = vadd.f32 %v402_v25, %v401_v22  ;;  %v503_v22 = vld [vmem:[%s1311_s5] sm:$0xff] }
  0x2e   : > { %v419_v29 = vmul.f32 %v417_v27, %v410_v26  ;;  %v418_v30 = vmul.f32 %v417_v27, %v403_v28 }
  0x30   : > { %v422_v31 = vrot.slane %v419_v29, 4 }
  0x31   : > { %506 = vperm.xlu2 %1025, %v503_v22  }
  0x32   : > { %v423_v32 = vsel %vm396_vm0, %v418_v30, %v422_v31 }
  0x33   : > { %v425_v33 = vsub.f32 %v389_v5, %v423_v32  ;;  %v483_v5 = vunpack.c.l.s4 %v1118_v4 }
  0x35   : > { %v426_v34 = vmul.f32 %v425_v33, %v425_v33  ;;  %v484_v8 = vunpack.c.0.s8 %v483_v5 }
  0x37   : > { %428 = vst [vmem:[#allocation1] ss:$2 sm:$0xff] %v426_v34 }
  0x3e   : > { %v430_v35 = vld.sshfl [vmem:[#allocation1 + $0x8] sm:$0xff pattern:$0x75316420]  ;;  %v429_v37 = vld.sshfl [vmem:[#allocation1] sm:$0xff pattern:$0x75316420] }
  0x3f   : > { %v440_v36 = vsel %vm396_vm0, %v430_v35, 0.0  ;;  %v433_v39 = vsel %vm396_vm0, %v429_v37, 0.0 }
  0x40   : > { %v441_v38 = vrot.slane %v440_v36, 4  ;;  %v434_v40 = vrot.slane %v433_v39, 4 }
  0x42   : > { %v442_v41 = vadd.f32 %v441_v38, %v440_v36  ;;  %v435_v42 = vadd.f32 %v434_v40, %v433_v39 }
  0x44   : > { %v443_v43 = vrot.slane %v442_v41, 2  ;;  %v436_v44 = vrot.slane %v435_v42, 2 }
  0x46   : > { %v444_v45 = vadd.f32 %v443_v43, %v442_v41  ;;  %v437_v46 = vadd.f32 %v436_v44, %v435_v42 }
  0x48   : > { %v445_v47 = vrot.slane %v444_v45, 1  ;;  %v438_v48 = vrot.slane %v437_v46, 1 }
  0x4a   : > { %v446_v49 = vadd.f32 %v445_v47, %v444_v45  ;;  %v439_v50 = vadd.f32 %v438_v48, %v437_v46 }
  0x4c   : > { %v448_v51 = vmul.f32 %v446_v49, %v417_v27  ;;  %v447_v52 = vmul.f32 %v439_v50, %v417_v27 }
  0x4e   : > { %v450_v53 = vadd.f32 1e-05, %v448_v51  ;;  %v449_v54 = vadd.f32 1e-05, %v447_v52 }
  0x50   : > { %1028 = vrsqrt.f32 %v450_v53  ;;  %vm467_vm2 = vweird.f32 %v450_v53  ;;  %vm457_vm5 = vweird.f32 %v449_v54 }
  0x51   : > { %1030 = vrsqrt.f32 %v449_v54 }
  0x56   : > { %v1029_v55 = vpop.eup %1028 }
  0x57   : > { %v462_v56 = vmul.f32 %v1029_v55, %v450_v53  ;;  %v1031_v57 = vpop.eup %1030  ;;  %vm468_vm3 = vweird.f32 %v1029_v55 }
  0x58   : > { %v452_v58 = vmul.f32 %v1031_v57, %v449_v54  ;;  %vm469_vm4 = vmor %vm467_vm2, %vm468_vm3  ;;  %vm458_vm6 = vweird.f32 %v1031_v57 }
  0x59   : > { %v463_v59 = vmul.f32 %v1029_v55, %v462_v56  ;;  %vm459_vm7 = vmor %vm457_vm5, %vm458_vm6 }
  0x5a   : > { %v453_v60 = vmul.f32 %v1031_v57, %v452_v58 }
  0x5b   : > { %v464_v61 = vmul.f32 0.5, %v463_v59 }
  0x5c   : > { %v454_v62 = vmul.f32 0.5, %v453_v60 }
  0x5d   : > { %v465_v63 = vsub.f32 1.5, %v464_v61 }
  0x5e   : > { %v455_v0 = vsub.f32 1.5, %v454_v62 }
  0x5f   : > { %v466_v1 = vmul.f32 %v1029_v55, %v465_v63 }
  0x60   : > { %v456_v2 = vmul.f32 %v1031_v57, %v455_v0 }
  0x61   : > { %v470_v3 = vsel %vm469_vm4, %v1029_v55, %v466_v1 }
  0x62   : > { %v473_v6 = vrot.slane %v470_v3, 4  ;;  %v460_v7 = vsel %vm459_vm7, %v1031_v57, %v456_v2 }
  0x64   : > { %v474_v10 = vsel %vm396_vm0, %v460_v7, %v473_v6 }
  0x65   : > { %v476_v11 = vmul.f32 %v474_v10, %v425_v33 }
  0x83   : > { %v598_v25 = vpop.permute.xlu2 %597 }
  0x88   : > { %v481_v9 = vpop.permute.xlu0 %480 }
  0x89   : > { %v485_v12 = vperm.slane %v481_v9, %v484_v8 }
  0x8b   : > { %v487_v13 = vmul.f32 %v485_v12, %v476_v11 }
  0x90   : > { %v492_v14 = vpop.permute.xlu0 %491 }
  0x91   : > { %v496_v15 = vperm.slane %v492_v14, %v484_v8 }
  0x93   : > { %v498_v16 = vadd.f32 %v496_v15, %v487_v13 }
  0x95   : > { %542 = vst [vmem:[#allocation1] ss:$2 sm:$0xff] %v498_v16 }
  0x9c   : > { %v543_v17 = vld.sshfl [vmem:[#allocation1] sm:$0xff pattern:$0x75316420]  ;;  %v544_v18 = vld.sshfl [vmem:[#allocation1 + $0x8] sm:$0xff pattern:$0x75316420] }
  0x9d   : > { %948 = vmatpush.msk.msra.mxu0 %vm396_vm0, %v543_v17  ;;  %950 = vmatpush.msk.msra.mxu1 %vm396_vm0, %v544_v18  ;;  %632 = vst [vmem:[#allocation1] ss:$2 sm:$0xff] %v498_v16 }
  0xa4   : > { %v633_v20 = vld.sshfl [vmem:[#allocation1] sm:$0xff pattern:$0x75316420]  ;;  %v634_v21 = vld.sshfl [vmem:[#allocation1 + $0x8] sm:$0xff pattern:$0x75316420] }
  0xa5   : > { %952 = vmatpush.msk.msra.mxu2 %vm396_vm0, %v633_v20  ;;  %954 = vmatpush.msk.msra.mxu3 %vm396_vm0, %v634_v21 }
  0xb9   : > { %v616_v23 = vpop.trf.xlu1 }
  0xba   : > { %953 = vmatmul.msk.f32.vlgmr.msra.gmra.mxu2 %vm545_vm8, %v616_v23  ;;  %955 = vmatmul.msk.f32.vlgmr.msra.gmra.mxu3 %vm545_vm8, %v616_v23 }
  0xc1   : > { %v525_v24 = vpop.trf.xlu1 }
  0xc2   : > { %949 = vmatmul.msk.f32.vlgmr.msra.gmra.mxu0 %vm545_vm8, %v525_v24  ;;  %951 = vmatmul.msk.f32.vlgmr.msra.gmra.mxu1 %vm545_vm8, %v525_v24 }
 0x13d   : > { %v659_v26 = vpop.f32.mrf.mxu2  ;;  %v679_v27 = vpop.f32.mrf.mxu3 }
 0x13e   : > { %v1247_v28 = vadd.f32 %v659_v26, %v598_v25  ;;  %v1249_v29 = vadd.f32 %v679_v27, %v598_v25 }
 0x140   : > { %v1252_v30 = vmul.f32 0.70710677, %v1247_v28  ;;  %v1255_v31 = vmul.f32 0.70710677, %v1249_v29 }
 0x142   : > { %v686_v32 = vmul.f32 %v1252_v30, %v1252_v30  ;;  %v726_v33 = vmul.f32 %v1255_v31, %v1255_v31 }
 0x144   : > { %v687_v34 = vmin.f32 %v686_v32, 16.0  ;;  %v727_v35 = vmin.f32 %v726_v33, 16.0 }
 0x146   : > { %v688_v36 = vmul.f32 2.1237322e-06, %v687_v34  ;;  %v699_v37 = vmul.f32 3.8918573e-05, %v687_v34  ;;  %v728_v38 = vmul.f32 2.1237322e-06, %v727_v35 }
 0x147   : > { %v739_v39 = vmul.f32 3.8918573e-05, %v727_v35 }
 0x148   : > { %v689_v40 = vadd.f32 0.00028619796, %v688_v36  ;;  %v700_v41 = vadd.f32 0.001143296, %v699_v37  ;;  %v729_v42 = vadd.f32 0.00028619796, %v728_v38 }
 0x149   : > { %v740_v43 = vadd.f32 0.001143296, %v739_v39 }
 0x14a   : > { %v690_v44 = vmul.f32 %v689_v40, %v687_v34  ;;  %v701_v45 = vmul.f32 %v700_v41, %v687_v34  ;;  %v730_v46 = vmul.f32 %v729_v42, %v727_v35  ;;  %v571_v41 = vpop.f32.mrf.mxu0 }
 0x14b   : > { %v741_v47 = vmul.f32 %v740_v43, %v727_v35 }
 0x14c   : > { %v691_v48 = vadd.f32 0.0036580483, %v690_v44  ;;  %v702_v49 = vadd.f32 0.014752088, %v701_v45  ;;  %v731_v52 = vadd.f32 0.0036580483, %v730_v46  ;;  %v591_v44 = vpop.f32.mrf.mxu1 }
 0x14d   : > { %v742_v50 = vadd.f32 0.014752088, %v741_v47  ;;  %v683_v45 = vmul.f32 0.5, %v1249_v29 }
 0x14e   : > { %v703_v51 = vmul.f32 %v702_v49, %v687_v34  ;;  %v692_v54 = vmul.f32 %v691_v48, %v687_v34  ;;  %v732_v58 = vmul.f32 %v731_v52, %v727_v35 }
 0x14f   : > { %v743_v53 = vmul.f32 %v742_v50, %v727_v35 }
 0x150   : > { %v704_v55 = vadd.f32 0.112945676, %v703_v51  ;;  %v693_v60 = vadd.f32 0.05243302, %v692_v54  ;;  %v733_v0 = vadd.f32 0.05243302, %v732_v58 }
 0x151   : > { %v744_v56 = vadd.f32 0.112945676, %v743_v53 }
 0x152   : > { %v705_v57 = vmul.f32 %v704_v55, %v687_v34  ;;  %v694_v2 = vmul.f32 %v693_v60, %v687_v34  ;;  %v734_v5 = vmul.f32 %v733_v0, %v727_v35 }
 0x153   : > { %v745_v59 = vmul.f32 %v744_v56, %v727_v35 }
 0x154   : > { %v706_v61 = vadd.f32 0.4994258, %v705_v57  ;;  %v695_v6 = vadd.f32 0.18741608, %v694_v2  ;;  %v735_v7 = vadd.f32 0.18741608, %v734_v5 }
 0x155   : > { %v746_v62 = vadd.f32 0.4994258, %v745_v59 }
 0x156   : > { %v707_v63 = vmul.f32 %v706_v61, %v687_v34  ;;  %v696_v9 = vmul.f32 %v695_v6, %v687_v34  ;;  %v736_v12 = vmul.f32 %v735_v7, %v727_v35 }
 0x157   : > { %v747_v1 = vmul.f32 %v746_v62, %v727_v35 }
 0x158   : > { %v708_v3 = vadd.f32 1.0, %v707_v63  ;;  %v697_v15 = vadd.f32 1.1283791, %v696_v9  ;;  %v737_v21 = vadd.f32 1.1283791, %v736_v12 }
 0x159   : > { %v748_v4 = vadd.f32 1.0, %v747_v1 }
 0x15a   : > { %1032 = vrcp.f32 %v708_v3  ;;  %v720_v16 = vand.u32 2147483648, %v708_v3  ;;  %v718_v19 = vand.u32 2147483647, %v708_v3  ;;  %vm714_vm11 = vweird.f32 %v708_v3 }
 0x15b   : > { %1034 = vrcp.f32 %v748_v4  ;;  %v760_v20 = vand.u32 2147483648, %v748_v4  ;;  %v758_v23 = vand.u32 2147483647, %v748_v4  ;;  %vm754_vm13 = vweird.f32 %v748_v4 }
 0x15c   : > { %v721_v25 = vor.u32 1.1754944e-38, %v720_v16  ;;  %v698_v27 = vmul.f32 %v697_v15, %v1252_v30  ;;  %vm719_vm14 = vcmp.eq.f32.partialorder %v718_v19, 8.507059e+37  ;;  %v738_v35 = vmul.f32 %v737_v21, %v1255_v31  ;;  %v507_v31 = vpop.permute.xlu2 %506 }
 0x15d   : > { %v761_v33 = vor.u32 1.1754944e-38, %v760_v20  ;;  %vm759_vm0 = vcmp.eq.f32.partialorder %v758_v23, 8.507059e+37  ;;  %v682_v30 = vmul.f32 0.5, %v1247_v28  ;;  %v572_v47 = vadd.f32 %v571_v41, %v507_v31 }
 0x15e   : > { %v592_v49 = vadd.f32 %v591_v44, %v507_v31 }
 0x160   : > { %v1033_v8 = vpop.eup %1032 }
 0x161   : > { %v1035_v10 = vpop.eup %1034  ;;  %v710_v11 = vmul.f32 %v1033_v8, %v708_v3  ;;  %vm715_vm9 = vweird.f32 %v1033_v8 }
 0x162   : > { %v750_v13 = vmul.f32 %v1035_v10, %v748_v4  ;;  %vm755_vm10 = vweird.f32 %v1035_v10  ;;  %vm716_vm12 = vmor %vm714_vm11, %vm715_vm9 }
 0x163   : > { %v711_v14 = vsub.f32 1.0, %v710_v11  ;;  %vm756_vm15 = vmor %vm754_vm13, %vm755_vm10 }
 0x164   : > { %v751_v17 = vsub.f32 1.0, %v750_v13 }
 0x165   : > { %v712_v18 = vmul.f32 %v1033_v8, %v711_v14 }
 0x166   : > { %v752_v22 = vmul.f32 %v1035_v10, %v751_v17 }
 0x167   : > { %v713_v24 = vadd.f32 %v1033_v8, %v712_v18 }
 0x168   : > { %v753_v26 = vadd.f32 %v1035_v10, %v752_v22 }
 0x169   : > { %v717_v32 = vsel %vm716_vm12, %v1033_v8, %v713_v24 }
 0x16a   : > { %v722_v34 = vsel %vm719_vm14, %v721_v25, %v717_v32  ;;  %v757_v36 = vsel %vm756_vm15, %v1035_v10, %v753_v26 }
 0x16b   : > { %v723_v37 = vmul.f32 %v722_v34, %v698_v27  ;;  %v762_v38 = vsel %vm759_vm0, %v761_v33, %v757_v36 }
 0x16c   : > { %v763_v39 = vmul.f32 %v762_v38, %v738_v35 }
 0x16d   : > { %v956_v40 = vclamps-f32 %v723_v37, 1.0 }
 0x16e   : > { %v957_v42 = vclamps-f32 %v763_v39, 1.0 }
 0x16f   : > { %v766_v43 = vadd.f32 1.0, %v956_v40 }
 0x170   : > { %v767_v46 = vadd.f32 1.0, %v957_v42 }
 0x171   : > { %v768_v48 = vmul.f32 %v766_v43, %v682_v30 }
 0x172   : > { %v769_v50 = vmul.f32 %v767_v46, %v683_v45 }
 0x173   : > { %v770_v51 = vmul.f32 %v768_v48, %v572_v47 }
 0x174   : > { %v771_v52 = vmul.f32 %v769_v50, %v592_v49 }
 0x175   : > { %772 = vst [vmem:[%s357_s27] sm:$0xff] %v770_v51 }
 0x176   : > { %773 = vst [vmem:[%s357_s27 + $0x8] sm:$0xff] %v771_v52 }
 0x177   : > { %1063 = shalt.err (!%p1060_p5)
}
 0x178   : > { %965 = dma.vmem_to_hbm [thread:$0]  (%p1199_p4), %s793_s8, 256, %s795_s10, %s775_s12  }
 0x179 PF: > { %p971_p6 = scmp.ge.s32.totalorder %s1114_s29, 2  ;;  %s806_s19 = sand.u32 1, %s1094_s24  }
 0x17a   : > { %s807_s23 = scalar_lea.sflag [#allocation4], %s806_s19 }
 0x17b   : > { %p968_p7 = pnand %p971_p6, %p1206_p8 }
 0x17d   : > { %p969_p9 = pneg %p968_p7 }
 0x17f   : > { %1089 = dma.done.wait (%p969_p9), %s807_s23, 256  }
 0x180   : > { %1091 = vsyncadd (%p969_p9), %s807_s23, 4294967040  ;;  %s20_s29 = sadd.s32 1, %s1114_s29   ;;  %s1316_s24 = smov %s1098_s25 }
 0x181   : > { %p17_p10 = scmp.ge.s32.totalorder %s20_s29, 4   ;;  %s1317_s25 = smov %s1102_s26 }
 0x182   : > { %s1318_s26 = smov %s1212_s14  ;;  %s1319_s27 = smov %s1110_s28 }
 0x183   : > { %s1320_s28 = smov %s1322_s9  ;;  %19 = sbr.rel (!%p17_p10) target bundleno = 4 (0x4), region = 99 }
 0x188   :  { %813 = vsyncpa [#allocation4], 1 }
 0x189   :  { %815 = vsyncpa [#allocation4 + $0x1], 1 }

</bundles_post_ra>
